<compile_context>
chip_gen: v7x
topology: tpu7x:2x2x1
jax: 0.10.0
libtpu: 0.0.40
codegen_flags: <defaults>
</compile_context>

<pallas_src>
import functools

import jax
import jax.numpy as jnp
from jax.experimental import pallas as pl
from jax.experimental.pallas import tpu as pltpu

LANES = 128  # TPU lane width: keep the output-channel axis lane-dense.


def conv_stem_matmul_kernel(patches_ref, w_ref, o_ref):
    # patches_ref: (TM, K) bf16   w_ref: (K, 128) bf16   o_ref: (TM, 128) f32
    o_ref[...] = jnp.dot(
        patches_ref[...], w_ref[...], preferred_element_type=jnp.float32
    )


def _round_up(x, n):
    return ((x + n - 1) // n) * n


def _choose_tm(m):
    """Big tiles amortize the ~0.35us/grid-step overhead; keep >=4 tiles when
    M is large enough so v7x's two TensorCores both get work."""
    if m >= 4096:
        return 1024
    tm = max(128, _round_up(pl.cdiv(m, 4), 8))
    return min(tm, _round_up(m, 8))


def _im2col_nchw_bf16(x, kh, kw, stride, pad):
    """Glue: extract strided 3x3 patches directly in bf16 (halves HBM bytes of
    the dominant stream).  K ordered as (C_in, KH, KW) to match the OIHW
    weight reshape."""
    n, c, h, w = x.shape
    xp = jnp.pad(x.astype(jnp.bfloat16), ((0, 0), (0, 0), (pad, pad), (pad, pad)))
    ho = (h + 2 * pad - kh) // stride + 1
    wo = (w + 2 * pad - kw) // stride + 1
    taps = []
    for i in range(kh):
        for j in range(kw):
            taps.append(xp[:, :, i:i + stride * ho:stride, j:j + stride * wo:stride])
    stacked = jnp.stack(taps, axis=2)                       # (N, C, KH*KW, Ho, Wo)
    patches = stacked.transpose(0, 3, 4, 1, 2).reshape(n * ho * wo, c * kh * kw)
    return patches, ho, wo


def conv_stem_pallas(x_nchw, w_kl, c_out, *, kh=3, kw=3, stride=2, pad=1):
    """Conv2d(C_in -> c_out, k=3, s=2, p=1, bias=False) as a Pallas MXU matmul.

    Output is channels-last (N, Ho, Wo, c_out) — the TPU-friendly layout for the
    downstream encoder; numerics are identical to the PyTorch NCHW conv.
    """
    n, c_in, h, w = x_nchw.shape
    k, lanes = w_kl.shape
    assert k == c_in * kh * kw and lanes == LANES

    patches, ho, wo = _im2col_nchw_bf16(x_nchw, kh, kw, stride, pad)  # (M, K) bf16
    m = n * ho * wo
    tm = _choose_tm(m)

    out = pl.pallas_call(
        conv_stem_matmul_kernel,
        out_shape=jax.ShapeDtypeStruct((m, LANES), jnp.float32),
        grid=(pl.cdiv(m, tm),),                 # ragged last tile masked by Pallas
        in_specs=[
            pl.BlockSpec((tm, k), lambda i: (i, 0)),
            pl.BlockSpec((k, LANES), lambda i: (0, 0)),    # resident weight tile
        ],
        out_specs=pl.BlockSpec((tm, LANES), lambda i: (i, 0)),
        compiler_params=pltpu.CompilerParams(dimension_semantics=("parallel",)),
    )(patches, w_kl)

    # Drop the zero lanes and restore spatial structure; stay channels-last.
    return out[:, :c_out].reshape(n, ho, wo, c_out)


def make_stem_weight_oihw(key):
    # __init__: old stem is Conv2d(3, 48, 3, stride=2, padding=1, bias=False);
    # deterministic synthetic "pretrained" weights stand in for the checkpoint.
    old_w = 0.1 * jax.random.normal(key, (48, 3, 3, 3), dtype=jnp.float32)
    # new_input_layer.weight[:, :3] = old/2 ; weight[:, 3:] = old/2
    return jnp.concatenate([old_w / 2.0, old_w / 2.0], axis=1)      # (48, 6, 3, 3)


def prep_stem_weight_for_kernel(w_oihw):
    """Hoisted constant prep: (C_out, C_in, KH, KW) -> (K, 128) bf16, zero-padded
    on the lane axis so kernel stores are full-width (no masked vst)."""
    c_out, c_in, kh, kw = w_oihw.shape
    k = c_in * kh * kw
    w2d = w_oihw.reshape(c_out, k).T                                # (K, C_out)
    return jnp.pad(w2d, ((0, 0), (0, LANES - c_out))).astype(jnp.bfloat16)


@functools.partial(jax.jit, static_argnums=(2,))
def n_input_chan_unet_stem_forward(x_nchw, w_kl, c_out):
    """Forward of the module-defined portion of NInputChanUnet(n_channels_in=6):
    the replaced encoder.conv_stem.  Returns channels-last (N, Ho, Wo, 48)."""
    return conv_stem_pallas(x_nchw, w_kl, c_out)


if __name__ == "__main__":
    key = jax.random.PRNGKey(0)
    x = jax.random.normal(jax.random.fold_in(key, 1), (2, 6, 16, 16), dtype=jnp.float32)

    w_oihw = make_stem_weight_oihw(key)
    w_kl = prep_stem_weight_for_kernel(w_oihw)      # (54, 128) bf16, built once

    out = jax.block_until_ready(n_input_chan_unet_stem_forward(x, w_kl, 48))

    # Reference: identical bf16-rounded operands, f32 math, channels-last output.
    x_bf = x.astype(jnp.bfloat16).astype(jnp.float32)
    w_bf = w_oihw.astype(jnp.bfloat16).astype(jnp.float32)
    ref = jax.lax.conv_general_dilated(
        x_bf, w_bf, window_strides=(2, 2), padding=((1, 1), (1, 1)),
        dimension_numbers=("NCHW", "OIHW", "NHWC"),
    )
    assert out.shape == (2, 8, 8, 48), out.shape
    assert jnp.allclose(out, ref, atol=1e-3, rtol=1e-3), float(jnp.max(jnp.abs(out - ref)))

    print("KERNEL_OK")
</pallas_src>

<mosaic_0001>
module attributes {stable_mosaic.version = 11 : i64} {
  func.func @conv_stem_matmul_kernel(%arg0: i32, %arg1: memref<128x54xbf16, #tpu.memory_space<vmem>>, %arg2: memref<54x128xbf16, #tpu.memory_space<vmem>>, %arg3: memref<128x128xf32, #tpu.memory_space<vmem>>) attributes {dimension_semantics = [#tpu.dimension_semantics<parallel>], iteration_bounds = array<i64: 1>, scalar_prefetch = 0 : i64, scratch_operands = 0 : i64, tpu.core_type = #tpu.core_type<tc>, window_params = [{transform_indices = @transform_0, window_bounds = array<i64: 128, 54>}, {pipeline_mode = #tpu.pipeline_mode<synchronous>, transform_indices = @transform_1, window_bounds = array<i64: 54, 128>}, {transform_indices = @transform_2, window_bounds = array<i64: 128, 128>}]} {
    %c0 = arith.constant 0 : index
    %c0_0 = arith.constant 0 : index
    %0 = vector.load %arg1[%c0, %c0_0] : memref<128x54xbf16, #tpu.memory_space<vmem>>, vector<128x54xbf16>
    %c0_1 = arith.constant 0 : index
    %c0_2 = arith.constant 0 : index
    %1 = vector.load %arg2[%c0_1, %c0_2] : memref<54x128xbf16, #tpu.memory_space<vmem>>, vector<54x128xbf16>
    %cst = arith.constant dense<0.000000e+00> : vector<128x128xf32>
    %2 = tpu.matmul %0, %1, %cst {dimension_numbers = #tpu.dot_dimension_numbers<[1], [0], [0], [1], [0, 0, 1, 1], [], []>} : vector<128x54xbf16>, vector<54x128xbf16>, vector<128x128xf32> -> vector<128x128xf32>
    %c0_3 = arith.constant 0 : index
    %c0_4 = arith.constant 0 : index
    %3 = vector.load %arg3[%c0_3, %c0_4] : memref<128x128xf32, #tpu.memory_space<vmem>>, vector<128x128xf32>
    tpu.vector_store %arg3[%c0_3, %c0_4], %2 {strides = array<i32>} : memref<128x128xf32, #tpu.memory_space<vmem>>, vector<128x128xf32>,
    return
  }
  func.func @transform_0(%arg0: i32) -> (i32, i32) {
    %c0_i32 = arith.constant 0 : i32
    %c0_i32_0 = arith.constant 0 : i32
    return %arg0, %c0_i32 : i32, i32
  }
  func.func @transform_1(%arg0: i32) -> (i32, i32) {
    %c0_i32 = arith.constant 0 : i32
    %c0_i32_0 = arith.constant 0 : i32
    %c0_i32_1 = arith.constant 0 : i32
    return %c0_i32, %c0_i32_0 : i32, i32
  }
  func.func @transform_2(%arg0: i32) -> (i32, i32) {
    %c0_i32 = arith.constant 0 : i32
    %c0_i32_0 = arith.constant 0 : i32
    return %arg0, %c0_i32 : i32, i32
  }
}

</mosaic_0001>

<bundles_post_ra>
// kernel: n_input_chan_unet_stem_forward.1
= control target key start
LH: loop header
LB: loop body
LE: loop exit
PB: predicated region body
PF: predicated region fallthrough
CT: control target
= control target key end

     0   :  { %vm97_vm0 = vcmask 441344   ;;  %vm122_vm1 = vcmask 1042432   ;;  %s434_s0 = inlined_call_operand.vmem [shape: bf16[128,54], index: 0, kind: input, shape index: {}]   ;;  %s435_s1 = inlined_call_operand.vmem [shape: bf16[54,128], index: 1, kind: input, shape index: {}]   ;;  %s436_s2 = inlined_call_operand.hbm [shape: f32[128,128], index: 2, kind: output, shape index: {}]  }
   0x1   :  { %v324_v0 = vld [vmem:[%s435_s1] sm:$0xff]   ;;  %v325_v1 = vld [vmem:[%s435_s1 + $0x8] sm:$0xff]   ;;  %v326_v2 = vld [vmem:[%s435_s1 + $0x10] sm:$0xff]  }
   0x2   :  { %287 = vmatprep.subr.bf16.mxu0 %v324_v0  ;;  %311 = vmatprep.subr.bf16.mxu1 %v324_v0  ;;  %v328_v3 = vld [vmem:[%s434_s0] sm:$0xff]   ;;  %v327_v5 = vld [vmem:[%s435_s1 + $0x18] ss:$0 sps:$4 sm:$0x77]  }
   0x3   :  { %288 = vmatpush3.bf16.msra.mxu0 %v324_v0  ;;  %315 = vmatpush3.bf16.msra.mxu1 %v324_v0  ;;  %v329_v4 = vld [vmem:[%s434_s0 + $0x20] sm:$0xff]  }
   0x4   :  { %289 = vmatprep.subr.bf16.mxu0 %v325_v1  ;;  %312 = vmatprep.subr.bf16.mxu1 %v325_v1 }
   0x5   :  { %295 = vmatprep.mubr.msk.bf16.mxu0 %vm97_vm0, %v328_v3  ;;  %303 = vmatprep.mubr.msk.bf16.mxu1 %vm97_vm0, %v329_v4 }
   0x7   :  { %290 = vmatpush3.bf16.msra.mxu0 %v325_v1  ;;  %316 = vmatpush3.bf16.msra.mxu1 %v325_v1 }
   0x8   :  { %291 = vmatprep.subr.bf16.mxu0 %v326_v2  ;;  %313 = vmatprep.subr.bf16.mxu1 %v326_v2 }
   0xb   :  { %292 = vmatpush3.bf16.msra.mxu0 %v326_v2  ;;  %317 = vmatpush3.bf16.msra.mxu1 %v326_v2 }
   0xc   :  { %7 = vsyncpa [#allocation3], 0  ;;  %319 = vmatprep.subr.msk.bf16.mxu0 %vm122_vm1, %v327_v5  ;;  %320 = vmatprep.subr.msk.bf16.mxu1 %vm122_vm1, %v327_v5  ;;  %v124_v6 = vsel %vm122_vm1, %v327_v5, 0  ;;  %v330_v7 = vld [vmem:[%s434_s0 + $0x8] sm:$0xff]   ;;  %v332_v9 = vld [vmem:[%s434_s0 + $0x10] sm:$0xff]  }
   0xd   :  { %v331_v8 = vld [vmem:[%s434_s0 + $0x28] sm:$0xff]   ;;  %v333_v10 = vld [vmem:[%s434_s0 + $0x30] sm:$0xff]   ;;  %v334_v11 = vld [vmem:[%s434_s0 + $0x18] sm:$0xff]  }
   0xe   :  { %v335_v12 = vld [vmem:[%s434_s0 + $0x38] sm:$0xff]   ;;  %s360_s0 = smov [#allocation2]  }
   0xf   :  { %294 = vmatpush3.bf16.msra.mxu0 %v124_v6  ;;  %318 = vmatpush3.bf16.msra.mxu1 %v124_v6  ;;  %s244_s4 = sshll.u32 %s360_s0, 4  ;;  %s245_s4 = int_to_ptr.vmem [resolvable:$true] %s244_s4 }
  0x10   :  { %s336_s5 = scalar_lea.vmem %s245_s4, 2048  ;;  %p341_p1 = scmp.lt.s32.totalorder %s245_s4, %s245_s4 }
  0x11   :  { %p337_p0 = scmp.ne.s32.totalorder %s245_s4, %s336_s5  ;;  %p342_p2 = scmp.lt.s32.totalorder %s336_s5, %s336_s5 }
  0x12   :  { %296 = vmatmul.mubr.msk.bf16.vlgmr.msra.gmra.mrb[0].mxu0 %vm97_vm0, %v330_v7  ;;  %304 = vmatmul.mubr.msk.bf16.vlgmr.msra.gmra.mrb[0].mxu1 %vm97_vm0, %v331_v8 }
  0x13   :  { %299 = vmatprep.mubr.msk.bf16.mxu0 %vm97_vm0, %v332_v9  ;;  %307 = vmatprep.mubr.msk.bf16.mxu1 %vm97_vm0, %v333_v10  ;;  %p343_p3 = por %p342_p2, %p341_p1 }
  0x15   :  { %p344_p4 = pnand %p343_p3, %p337_p0 }
  0x1a   :  { %300 = vmatmul.mubr.msk.bf16.gmra.mrb[4].mxu0 %vm97_vm0, %v334_v11  ;;  %308 = vmatmul.mubr.msk.bf16.gmra.mrb[4].mxu1 %vm97_vm0, %v335_v12 }
  0xe5   :  { %v297_v13 = vpop.f32.mrb[0].mxu0  ;;  %v305_v14 = vpop.f32.mrb[0].mxu1 }
  0xe6   :  { %225 = vst [vmem:[#allocation2 + $0x10] sm:$0xff] %v297_v13  ;;  %233 = vst [vmem:[#allocation2 + $0x50] sm:$0xff] %v305_v14  ;;  %v160_v15 = vpop.f32.mrb[1].mxu0  ;;  %v192_v16 = vpop.f32.mrb[1].mxu1 }
  0xe7   :  { %223 = vst [vmem:[#allocation2] sm:$0xff] %v160_v15  ;;  %231 = vst [vmem:[#allocation2 + $0x40] sm:$0xff] %v192_v16  ;;  %v298_v17 = vpop.f32.mrb[2].mxu0  ;;  %v306_v18 = vpop.f32.mrb[2].mxu1 }
  0xe8   :  { %226 = vst [vmem:[#allocation2 + $0x18] sm:$0xff] %v298_v17  ;;  %234 = vst [vmem:[#allocation2 + $0x58] sm:$0xff] %v306_v18  ;;  %v163_v19 = vpop.f32.mrb[3].mxu0  ;;  %v195_v20 = vpop.f32.mrb[3].mxu1 }
  0xe9   :  { %224 = vst [vmem:[#allocation2 + $0x8] sm:$0xff] %v163_v19  ;;  %232 = vst [vmem:[#allocation2 + $0x48] sm:$0xff] %v195_v20 }
  0xed   :  { %v301_v21 = vpop.f32.mrb[4].mxu0  ;;  %v309_v22 = vpop.f32.mrb[4].mxu1 }
  0xee   :  { %229 = vst [vmem:[#allocation2 + $0x30] sm:$0xff] %v301_v21  ;;  %237 = vst [vmem:[#allocation2 + $0x70] sm:$0xff] %v309_v22  ;;  %v176_v23 = vpop.f32.mrb[5].mxu0  ;;  %v208_v24 = vpop.f32.mrb[5].mxu1 }
  0xef   :  { %227 = vst [vmem:[#allocation2 + $0x20] sm:$0xff] %v176_v23  ;;  %235 = vst [vmem:[#allocation2 + $0x60] sm:$0xff] %v208_v24  ;;  %v302_v25 = vpop.f32.mrb[6].mxu0  ;;  %v310_v26 = vpop.f32.mrb[6].mxu1 }
  0xf0   :  { %230 = vst [vmem:[#allocation2 + $0x38] sm:$0xff] %v302_v25  ;;  %238 = vst [vmem:[#allocation2 + $0x78] sm:$0xff] %v310_v26  ;;  %v179_v27 = vpop.f32.mrb[7].mxu0  ;;  %v211_v28 = vpop.f32.mrb[7].mxu1 }
  0xf1   :  { %228 = vst [vmem:[#allocation2 + $0x28] sm:$0xff] %v179_v27  ;;  %236 = vst [vmem:[#allocation2 + $0x68] sm:$0xff] %v211_v28 }
  0xf2   :  { %347 = shalt.err (!%p344_p4)
}
  0xf3   :  { %s348_s8 = scalar_lea.hbm %s436_s2, 2048 }
  0xf4   :  { %p349_p5 = scmp.ne.s32.totalorder %s436_s2, %s348_s8  ;;  %p352_p6 = scmp.lt.u32.totalorder %s348_s8, %s436_s2 }
  0xf6   :  { %p354_p7 = pnand %p352_p6, %p349_p5 }
  0xf8   :  { %357 = shalt.err (!%p354_p7)
}
  0xf9   :  { %s361_s13 = smov 128   ;;  %s362_s14 = smov 8  }
  0xfa   :  { %250 = dma.vmem_to_hbm [thread:$0]  %s245_s4, 2048, %s436_s2, [#allocation3], %s361_s13, %s361_s13, %s362_s14  }
  0xfb   :  { %358 = dma.done.wait [#allocation3], 2048  }
  0xfc   :  { %359 = vsyncadd [#allocation3], 4294965248 }
  0xfd   :  { %254 = vsyncpa [#allocation3], 1 }

</bundles_post_ra>
